<compile_context>
chip_gen: v7x
topology: tpu7x:2x2x1
jax: 0.10.0
libtpu: 0.0.40
codegen_flags: <defaults>
</compile_context>

<pallas_src>
import functools

import jax
import jax.numpy as jnp
from jax.experimental import pallas as pl
from jax.experimental.pallas import tpu as pltpu

NEG_SLOPE = 0.01   # nn.LeakyReLU() default
LANE = 128


def _round_up(n, m):
    return (n + m - 1) // m * m


def _leaky_relu(x):
    # max(x, a*x) == LeakyReLU(x) for 0 < a < 1: one VALU op instead of cmp+select.
    return jnp.maximum(x, NEG_SLOPE * x)


def _default_act_dtype():
    """bf16 activations on chips with a bf16 VPU (v6e/v7x), f32 otherwise."""
    try:
        kind = jax.devices()[0].device_kind.lower()
    except Exception:
        return jnp.float32
    if any(v in kind for v in ("v2", "v3", "v4", "v5")):
        return jnp.float32
    return jnp.bfloat16


# ----------------------------------------------------------------------------
# Kernel: one batch tile per grid step; everything else VMEM-resident.
# All arrays are feature-major: x_t (F, tb), h (H, tb), out (N, tb).
# ----------------------------------------------------------------------------
def mtl_kernel(xt_ref, w1t_ref, b1_ref, w2t_ref, b2_ref, wft_ref, bf_ref,
               out_ref, *, act_dtype):
    w_dtype = w2t_ref.dtype

    # stage 1: (input-BN + shared_l1 + bn1) folded into w1t/b1, then LeakyReLU
    h1 = jnp.dot(w1t_ref[...], xt_ref[...], preferred_element_type=jnp.float32)
    h1 = _leaky_relu((h1 + b1_ref[...]).astype(act_dtype)).astype(w_dtype)

    # stage 2: (shared_l2 + bn2) folded into w2t/b2, then LeakyReLU
    h2 = jnp.dot(w2t_ref[...], h1, preferred_element_type=jnp.float32)
    h2 = _leaky_relu((h2 + b2_ref[...]).astype(act_dtype)).astype(w_dtype)

    # fused task heads: rows = [attack | risk]; (N, tb) store is lane-dense.
    out_ref[...] = (jnp.dot(wft_ref[...], h2, preferred_element_type=jnp.float32)
                    + bf_ref[...]).astype(out_ref.dtype)


# ----------------------------------------------------------------------------
# Parameter folding (plain JAX glue; runs under jit with the kernel)
# ----------------------------------------------------------------------------
def _fold_bn(gamma, beta, mean, var, eps=1e-5):
    """Return (scale, shift) such that bn(y) == y * scale + shift."""
    scale = gamma / jnp.sqrt(var + eps)
    shift = beta - mean * scale
    return scale, shift


def _fold_params(params, compute_dtype):
    s0, t0 = _fold_bn(params["bn_in_g"], params["bn_in_b"],
                      params["bn_in_m"], params["bn_in_v"])
    s1, t1 = _fold_bn(params["bn1_g"], params["bn1_b"],
                      params["bn1_m"], params["bn1_v"])
    s2, t2 = _fold_bn(params["bn2_g"], params["bn2_b"],
                      params["bn2_m"], params["bn2_v"])

    # bn1(bn_in(x) @ w1 + b1) == x @ w1' + b1'
    w1 = (s0[:, None] * params["w1"]) * s1[None, :]          # [F, H1]
    b1 = (params["b1"] + t0 @ params["w1"]) * s1 + t1        # [H1]

    # bn2(h @ w2 + b2) == h @ w2' + b2'
    w2 = params["w2"] * s2[None, :]                          # [H1, H2]
    b2 = params["b2"] * s2 + t2                              # [H2]

    # fused heads [attack | risk]
    wf = jnp.concatenate([params["wa"], params["wr"]], axis=1)   # [H2, A+R]
    bf = jnp.concatenate([params["ba"], params["br"]], axis=0)   # [A+R]

    F, H1 = w1.shape
    H2 = w2.shape[1]
    H1p = _round_up(H1, LANE)
    H2p = _round_up(H2, LANE)

    # Transpose to (out, in) and zero-pad hidden dims (exact padding:
    # bias 0 -> leaky_relu(0) = 0 -> 0 * w = 0).
    w1t = jnp.pad(w1.T, ((0, H1p - H1), (0, 0)))             # [H1p, F]
    b1c = jnp.pad(b1, (0, H1p - H1)).reshape(-1, 1)          # [H1p, 1]
    w2t = jnp.pad(w2.T, ((0, H2p - H2), (0, H1p - H1)))      # [H2p, H1p]
    b2c = jnp.pad(b2, (0, H2p - H2)).reshape(-1, 1)          # [H2p, 1]
    wft = jnp.pad(wf.T, ((0, 0), (0, H2p - H2)))             # [N,  H2p]
    bfc = bf.reshape(-1, 1)                                  # [N,  1]

    cd = compute_dtype
    f32 = jnp.float32
    return (w1t.astype(cd), b1c.astype(f32),
            w2t.astype(cd), b2c.astype(f32),
            wft.astype(cd), bfc.astype(f32))


# ----------------------------------------------------------------------------
# Public forward
# ----------------------------------------------------------------------------
def enhanced_multitask_forward(x, params, *, block_b=8192, act_dtype=None,
                               compute_dtype=jnp.bfloat16):
    """x: [B, input_size] -> (out_attack [B, A], out_risk [B, R]) in f32."""
    B, F = x.shape
    A = params["wa"].shape[1]
    R = params["wr"].shape[1]
    N = A + R

    if act_dtype is None:
        act_dtype = _default_act_dtype()

    w1t, b1, w2t, b2, wft, bf = _fold_params(params, compute_dtype)
    H1p = w1t.shape[0]
    H2p = w2t.shape[0]

    # --- batch tiling -------------------------------------------------------
    # Balanced tiles (avoid a nearly-empty tail tile + wasteful padding),
    # granule = 128 because batch now sits on the lane dimension.
    # Cap the tile so f32/bf16 h1/h2 temporaries stay well inside v7x's 64 MiB.
    block_b = max(LANE, min(block_b, 16384))
    n_steps = max(-(-B // block_b), 1)
    if n_steps == 1 and B > 2 * LANE:
        n_steps = 2            # keep both v7x TensorCores busy
    tb = _round_up(-(-B // n_steps), LANE)
    Bp = _round_up(B, tb)

    # Transpose + cast fuse into one XLA pass over x (the cast pass existed
    # anyway); padded batch columns are zeros and get sliced off at the end.
    xt = x.T.astype(compute_dtype)                           # [F, B]
    if Bp != B:
        xt = jnp.pad(xt, ((0, 0), (0, Bp - B)))

    const = lambda i: (0, 0)   # weights/biases resident across grid steps
    bpe = jnp.dtype(compute_dtype).itemsize
    cost = pl.CostEstimate(
        flops=2 * Bp * (F * H1p + H1p * H2p + H2p * N),
        transcendentals=0,
        bytes_accessed=(Bp * F * bpe
                        + (F * H1p + H1p * H2p + H2p * N) * bpe
                        + Bp * N * 4),
    )

    out_t = pl.pallas_call(
        functools.partial(mtl_kernel, act_dtype=act_dtype),
        out_shape=jax.ShapeDtypeStruct((N, Bp), jnp.float32),
        grid=(Bp // tb,),
        in_specs=[
            pl.BlockSpec((F, tb), lambda i: (0, i)),    # x.T tile (streamed)
            pl.BlockSpec((H1p, F), const),              # w1.T  (resident)
            pl.BlockSpec((H1p, 1), const),              # b1
            pl.BlockSpec((H2p, H1p), const),            # w2.T
            pl.BlockSpec((H2p, 1), const),              # b2
            pl.BlockSpec((N, H2p), const),              # fused heads weight.T
            pl.BlockSpec((N, 1), const),                # fused heads bias
        ],
        out_specs=pl.BlockSpec((N, tb), lambda i: (0, i)),   # lane-dense slab
        compiler_params=pltpu.CompilerParams(
            dimension_semantics=("parallel",),
            vmem_limit_bytes=48 * 1024 * 1024),
        cost_estimate=cost,
    )(xt, w1t, b1, w2t, b2, wft, bf)

    out_attack = out_t[:A, :B].T
    out_risk = out_t[A:, :B].T
    return out_attack, out_risk


# ----------------------------------------------------------------------------
# PyTorch-style init (weights stored as [in_features, out_features])
# ----------------------------------------------------------------------------
def init_params(key, input_size, hidden_size1, hidden_size2,
                num_classes_attack, num_classes_risk):
    ks = jax.random.split(key, 8)

    def linear(kw, kb, fan_in, fan_out):
        bound = 1.0 / jnp.sqrt(fan_in)
        w = jax.random.uniform(kw, (fan_in, fan_out), jnp.float32, -bound, bound)
        b = jax.random.uniform(kb, (fan_out,), jnp.float32, -bound, bound)
        return w, b

    w1, b1 = linear(ks[0], ks[1], input_size, hidden_size1)
    w2, b2 = linear(ks[2], ks[3], hidden_size1, hidden_size2)
    wa, ba = linear(ks[4], ks[5], hidden_size2, num_classes_attack)
    wr, br = linear(ks[6], ks[7], hidden_size2, num_classes_risk)

    def bn(n):  # default BatchNorm1d state: gamma=1, beta=0, mean=0, var=1
        return (jnp.ones((n,), jnp.float32), jnp.zeros((n,), jnp.float32),
                jnp.zeros((n,), jnp.float32), jnp.ones((n,), jnp.float32))

    bn_in_g, bn_in_b, bn_in_m, bn_in_v = bn(input_size)
    bn1_g, bn1_b, bn1_m, bn1_v = bn(hidden_size1)
    bn2_g, bn2_b, bn2_m, bn2_v = bn(hidden_size2)

    return dict(
        w1=w1, b1=b1, w2=w2, b2=b2, wa=wa, ba=ba, wr=wr, br=br,
        bn_in_g=bn_in_g, bn_in_b=bn_in_b, bn_in_m=bn_in_m, bn_in_v=bn_in_v,
        bn1_g=bn1_g, bn1_b=bn1_b, bn1_m=bn1_m, bn1_v=bn1_v,
        bn2_g=bn2_g, bn2_b=bn2_b, bn2_m=bn2_m, bn2_v=bn2_v,
    )


def reference_forward(x, params):
    """Pure-JAX f32 reference of the eval-mode PyTorch forward."""
    s0, t0 = _fold_bn(params["bn_in_g"], params["bn_in_b"],
                      params["bn_in_m"], params["bn_in_v"])
    h = x * s0 + t0
    s1, t1 = _fold_bn(params["bn1_g"], params["bn1_b"],
                      params["bn1_m"], params["bn1_v"])
    h = (h @ params["w1"] + params["b1"]) * s1 + t1
    h = jnp.where(h > 0, h, NEG_SLOPE * h)
    s2, t2 = _fold_bn(params["bn2_g"], params["bn2_b"],
                      params["bn2_m"], params["bn2_v"])
    h = (h @ params["w2"] + params["b2"]) * s2 + t2
    h = jnp.where(h > 0, h, NEG_SLOPE * h)
    return h @ params["wa"] + params["ba"], h @ params["wr"] + params["br"]


if __name__ == "__main__":
    batch = 8
    input_size = 32
    hidden_size1 = 64
    hidden_size2 = 32
    num_classes_attack = 5
    num_classes_risk = 3

    key = jax.random.PRNGKey(0)
    kx, kp = jax.random.split(key)
    x = jax.random.normal(kx, (batch, input_size), jnp.float32)
    params = init_params(kp, input_size, hidden_size1, hidden_size2,
                         num_classes_attack, num_classes_risk)

    out_attack, out_risk = jax.jit(enhanced_multitask_forward)(x, params)
    jax.block_until_ready((out_attack, out_risk))

    ref_a, ref_r = reference_forward(x, params)
    assert out_attack.shape == (batch, num_classes_attack)
    assert out_risk.shape == (batch, num_classes_risk)
    # bf16 weight/activation streaming -> relaxed tolerance vs f32 reference.
    assert jnp.allclose(out_attack, ref_a, atol=5e-2, rtol=5e-2)
    assert jnp.allclose(out_risk, ref_r, atol=5e-2, rtol=5e-2)

    print("KERNEL_OK")
</pallas_src>

<mosaic_0001>
module attributes {stable_mosaic.version = 11 : i64} {
  func.func @mtl_kernel(%arg0: i32, %arg1: memref<32x128xbf16, #tpu.memory_space<vmem>>, %arg2: memref<128x32xbf16, #tpu.memory_space<vmem>>, %arg3: memref<128x1xf32, #tpu.memory_space<vmem>>, %arg4: memref<128x128xbf16, #tpu.memory_space<vmem>>, %arg5: memref<128x1xf32, #tpu.memory_space<vmem>>, %arg6: memref<8x128xbf16, #tpu.memory_space<vmem>>, %arg7: memref<8x1xf32, #tpu.memory_space<vmem>>, %arg8: memref<8x128xf32, #tpu.memory_space<vmem>>) attributes {dimension_semantics = [#tpu.dimension_semantics<parallel>], iteration_bounds = array<i64: 1>, scalar_prefetch = 0 : i64, scratch_operands = 0 : i64, tpu.core_type = #tpu.core_type<tc>, window_params = [{transform_indices = @transform_0, window_bounds = array<i64: 32, 128>}, {pipeline_mode = #tpu.pipeline_mode<synchronous>, transform_indices = @transform_1, window_bounds = array<i64: 128, 32>}, {pipeline_mode = #tpu.pipeline_mode<synchronous>, transform_indices = @transform_2, window_bounds = array<i64: 128, 1>}, {pipeline_mode = #tpu.pipeline_mode<synchronous>, transform_indices = @transform_3, window_bounds = array<i64: 128, 128>}, {pipeline_mode = #tpu.pipeline_mode<synchronous>, transform_indices = @transform_4, window_bounds = array<i64: 128, 1>}, {pipeline_mode = #tpu.pipeline_mode<synchronous>, transform_indices = @transform_5, window_bounds = array<i64: 8, 128>}, {pipeline_mode = #tpu.pipeline_mode<synchronous>, transform_indices = @transform_6, window_bounds = array<i64: 8, 1>}, {transform_indices = @transform_7, window_bounds = array<i64: 8, 128>}]} {
    %c0 = arith.constant 0 : index
    %c0_0 = arith.constant 0 : index
    %0 = vector.load %arg2[%c0, %c0_0] : memref<128x32xbf16, #tpu.memory_space<vmem>>, vector<128x32xbf16>
    %c0_1 = arith.constant 0 : index
    %c0_2 = arith.constant 0 : index
    %1 = vector.load %arg1[%c0_1, %c0_2] : memref<32x128xbf16, #tpu.memory_space<vmem>>, vector<32x128xbf16>
    %cst = arith.constant dense<0.000000e+00> : vector<128x128xf32>
    %2 = tpu.matmul %0, %1, %cst {dimension_numbers = #tpu.dot_dimension_numbers<[1], [0], [0], [1], [0, 0, 1, 1], [], []>} : vector<128x32xbf16>, vector<32x128xbf16>, vector<128x128xf32> -> vector<128x128xf32>
    %c0_3 = arith.constant 0 : index
    %c0_4 = arith.constant 0 : index
    %3 = vector.load %arg3[%c0_3, %c0_4] : memref<128x1xf32, #tpu.memory_space<vmem>>, vector<128x1xf32>
    %4 = vector.broadcast %3 : vector<128x1xf32> to vector<128x128xf32>
    %5 = arith.addf %2, %4 : vector<128x128xf32>
    %6 = arith.truncf %5 : vector<128x128xf32> to vector<128x128xbf16>
    %cst_5 = arith.constant 1.000980e-02 : bf16
    %7 = vector.broadcast %cst_5 : bf16 to vector<128x128xbf16>
    %8 = arith.mulf %7, %6 : vector<128x128xbf16>
    %9 = arith.maximumf %6, %8 : vector<128x128xbf16>
    %c0_6 = arith.constant 0 : index
    %c0_7 = arith.constant 0 : index
    %10 = vector.load %arg4[%c0_6, %c0_7] : memref<128x128xbf16, #tpu.memory_space<vmem>>, vector<128x128xbf16>
    %cst_8 = arith.constant dense<0.000000e+00> : vector<128x128xf32>
    %11 = tpu.matmul %10, %9, %cst_8 {dimension_numbers = #tpu.dot_dimension_numbers<[1], [0], [0], [1], [0, 0, 1, 1], [], []>} : vector<128x128xbf16>, vector<128x128xbf16>, vector<128x128xf32> -> vector<128x128xf32>
    %c0_9 = arith.constant 0 : index
    %c0_10 = arith.constant 0 : index
    %12 = vector.load %arg5[%c0_9, %c0_10] : memref<128x1xf32, #tpu.memory_space<vmem>>, vector<128x1xf32>
    %13 = vector.broadcast %12 : vector<128x1xf32> to vector<128x128xf32>
    %14 = arith.addf %11, %13 : vector<128x128xf32>
    %15 = arith.truncf %14 : vector<128x128xf32> to vector<128x128xbf16>
    %cst_11 = arith.constant 1.000980e-02 : bf16
    %16 = vector.broadcast %cst_11 : bf16 to vector<128x128xbf16>
    %17 = arith.mulf %16, %15 : vector<128x128xbf16>
    %18 = arith.maximumf %15, %17 : vector<128x128xbf16>
    %c0_12 = arith.constant 0 : index
    %c0_13 = arith.constant 0 : index
    %19 = vector.load %arg6[%c0_12, %c0_13] : memref<8x128xbf16, #tpu.memory_space<vmem>>, vector<8x128xbf16>
    %cst_14 = arith.constant dense<0.000000e+00> : vector<8x128xf32>
    %20 = tpu.matmul %19, %18, %cst_14 {dimension_numbers = #tpu.dot_dimension_numbers<[1], [0], [0], [1], [0, 0, 1, 1], [], []>} : vector<8x128xbf16>, vector<128x128xbf16>, vector<8x128xf32> -> vector<8x128xf32>
    %c0_15 = arith.constant 0 : index
    %c0_16 = arith.constant 0 : index
    %21 = vector.load %arg7[%c0_15, %c0_16] : memref<8x1xf32, #tpu.memory_space<vmem>>, vector<8x1xf32>
    %22 = vector.broadcast %21 : vector<8x1xf32> to vector<8x128xf32>
    %23 = arith.addf %20, %22 : vector<8x128xf32>
    %c0_17 = arith.constant 0 : index
    %c0_18 = arith.constant 0 : index
    %24 = vector.load %arg8[%c0_17, %c0_18] : memref<8x128xf32, #tpu.memory_space<vmem>>, vector<8x128xf32>
    tpu.vector_store %arg8[%c0_17, %c0_18], %23 {strides = array<i32>} : memref<8x128xf32, #tpu.memory_space<vmem>>, vector<8x128xf32>,
    return
  }
  func.func @transform_0(%arg0: i32) -> (i32, i32) {
    %c0_i32 = arith.constant 0 : i32
    %c0_i32_0 = arith.constant 0 : i32
    return %c0_i32, %arg0 : i32, i32
  }
  func.func @transform_1(%arg0: i32) -> (i32, i32) {
    %c0_i32 = arith.constant 0 : i32
    %c0_i32_0 = arith.constant 0 : i32
    %c0_i32_1 = arith.constant 0 : i32
    return %c0_i32, %c0_i32_0 : i32, i32
  }
  func.func @transform_2(%arg0: i32) -> (i32, i32) {
    %c0_i32 = arith.constant 0 : i32
    %c0_i32_0 = arith.constant 0 : i32
    %c0_i32_1 = arith.constant 0 : i32
    return %c0_i32, %c0_i32_0 : i32, i32
  }
  func.func @transform_3(%arg0: i32) -> (i32, i32) {
    %c0_i32 = arith.constant 0 : i32
    %c0_i32_0 = arith.constant 0 : i32
    %c0_i32_1 = arith.constant 0 : i32
    return %c0_i32, %c0_i32_0 : i32, i32
  }
  func.func @transform_4(%arg0: i32) -> (i32, i32) {
    %c0_i32 = arith.constant 0 : i32
    %c0_i32_0 = arith.constant 0 : i32
    %c0_i32_1 = arith.constant 0 : i32
    return %c0_i32, %c0_i32_0 : i32, i32
  }
  func.func @transform_5(%arg0: i32) -> (i32, i32) {
    %c0_i32 = arith.constant 0 : i32
    %c0_i32_0 = arith.constant 0 : i32
    %c0_i32_1 = arith.constant 0 : i32
    return %c0_i32, %c0_i32_0 : i32, i32
  }
  func.func @transform_6(%arg0: i32) -> (i32, i32) {
    %c0_i32 = arith.constant 0 : i32
    %c0_i32_0 = arith.constant 0 : i32
    %c0_i32_1 = arith.constant 0 : i32
    return %c0_i32, %c0_i32_0 : i32, i32
  }
  func.func @transform_7(%arg0: i32) -> (i32, i32) {
    %c0_i32 = arith.constant 0 : i32
    %c0_i32_0 = arith.constant 0 : i32
    return %c0_i32, %arg0 : i32, i32
  }
}

</mosaic_0001>

<bundles_post_ra>
// kernel: enhanced_multitask_forward.1
= control target key start
LH: loop header
LB: loop body
LE: loop exit
PB: predicated region body
PF: predicated region fallthrough
CT: control target
= control target key end

     0   :  { %v831_v1 = vmov 0   ;;  %vm196_vm0 = vcmask 261120   ;;  %vm833_vm1 = vmmov 0   ;;  %s1050_s0 = inlined_call_operand.vmem [shape: bf16[32,128], index: 0, kind: input, shape index: {}]   ;;  %s1051_s1 = inlined_call_operand.vmem [shape: bf16[128,32], index: 1, kind: input, shape index: {}]   ;;  %s1052_s2 = inlined_call_operand.vmem [shape: f32[128,1], index: 2, kind: input, shape index: {}]   ;;  %s1053_s4 = inlined_call_operand.vmem [shape: f32[128,1], index: 4, kind: input, shape index: {}]   ;;  %s1054_s6 = inlined_call_operand.vmem [shape: f32[8,1], index: 6, kind: input, shape index: {}]   ;;  %s1055_s3 = inlined_call_operand.vmem [shape: bf16[128,128], index: 3, kind: input, shape index: {}]   ;;  %s1056_s5 = inlined_call_operand.vmem [shape: bf16[8,128], index: 5, kind: input, shape index: {}]   ;;  %s1057_s7 = inlined_call_operand.vmem [shape: f32[8,128], index: 7, kind: output, shape index: {}]  }
   0x1   :  { %v813_v0 = vld [vmem:[%s1050_s0] sm:$0xff]   ;;  %811 = vset.pattern.permute.xlu0 %v831_v1  ;;  %812 = vset.pattern.permute.xlu1 %v831_v1  ;;  %v814_v2 = vld [vmem:[%s1050_s0 + $0x8] sm:$0xff]   ;;  %v817_v5 = vld [vmem:[%s1051_s1 + $0x10] sm:$0xff]  }
   0x2   :  { %736 = vmatprep.subr.bf16.mxu0 %v813_v0  ;;  %v815_v3 = vld [vmem:[%s1051_s1] sm:$0xff]   ;;  %v816_v4 = vld [vmem:[%s1051_s1 + $0x8] sm:$0xff]   ;;  %v50_v8 = vld [vmem:[%s1052_s2 + $0x10] sm:$0xff] }
   0x3   :  { %737 = vmatpush3.bf16.msra.mxu0 %v813_v0  ;;  %740 = vmatprep.mubr.msk.bf16.mxu0 %vm196_vm0, %v815_v3  ;;  %v48_v6 = vld [vmem:[%s1052_s2] sm:$0xff]  ;;  %v49_v7 = vld [vmem:[%s1052_s2 + $0x8] sm:$0xff]  ;;  %v51_v9 = vld [vmem:[%s1052_s2 + $0x18] sm:$0xff] }
   0x4   :  { %738 = vmatprep.subr.bf16.mxu0 %v814_v2  ;;  %66 = vperm.xlu0 %811, %v48_v6   ;;  %v818_v10 = vld [vmem:[%s1051_s1 + $0x18] sm:$0xff]   ;;  %v52_v11 = vld [vmem:[%s1052_s2 + $0x20] sm:$0xff]  ;;  %v53_v13 = vld [vmem:[%s1052_s2 + $0x28] sm:$0xff] }
   0x5   :  { %76 = vperm.xlu1 %812, %v50_v8   ;;  %v819_v12 = vld [vmem:[%s1051_s1 + $0x20] sm:$0xff]   ;;  %v54_v14 = vld [vmem:[%s1052_s2 + $0x30] sm:$0xff]  ;;  %v55_v15 = vld [vmem:[%s1052_s2 + $0x38] sm:$0xff] }
   0x6   :  { %v820_v16 = vld [vmem:[%s1051_s1 + $0x28] sm:$0xff]   ;;  %v56_v17 = vld [vmem:[%s1052_s2 + $0x40] sm:$0xff]  ;;  %v821_v18 = vld [vmem:[%s1051_s1 + $0x30] sm:$0xff]  }
   0x7   :  { %739 = vmatpush3.bf16.msra.mxu0 %v814_v2  ;;  %v57_v19 = vld [vmem:[%s1052_s2 + $0x48] sm:$0xff]  ;;  %v58_v20 = vld [vmem:[%s1052_s2 + $0x50] sm:$0xff]  ;;  %v59_v21 = vld [vmem:[%s1052_s2 + $0x58] sm:$0xff] }
   0x8   :  { %71 = vperm.xlu0 %811, %v49_v7   ;;  %v822_v22 = vld [vmem:[%s1051_s1 + $0x38] sm:$0xff]   ;;  %v60_v23 = vld [vmem:[%s1052_s2 + $0x60] sm:$0xff]  ;;  %v61_v24 = vld [vmem:[%s1052_s2 + $0x68] sm:$0xff] }
   0x9   :  { %81 = vperm.xlu1 %812, %v51_v9   ;;  %v62_v25 = vld [vmem:[%s1052_s2 + $0x70] sm:$0xff]  ;;  %v63_v26 = vld [vmem:[%s1052_s2 + $0x78] sm:$0xff]  ;;  %v358_v27 = vld [vmem:[%s1053_s4] sm:$0xff] }
   0xa   :  { %741 = vmatmul.mubr.msk.bf16.vlgmr.msra.gmra.mrb[0].mxu0 %vm196_vm0, %v816_v4  ;;  %v359_v28 = vld [vmem:[%s1053_s4 + $0x8] sm:$0xff]  ;;  %v360_v29 = vld [vmem:[%s1053_s4 + $0x10] sm:$0xff]  ;;  %v361_v30 = vld [vmem:[%s1053_s4 + $0x18] sm:$0xff] }
   0xb   :  { %744 = vmatprep.mubr.msk.bf16.mxu0 %vm196_vm0, %v817_v5  ;;  %v362_v31 = vld [vmem:[%s1053_s4 + $0x20] sm:$0xff]  ;;  %v363_v32 = vld [vmem:[%s1053_s4 + $0x28] sm:$0xff]  ;;  %v364_v33 = vld [vmem:[%s1053_s4 + $0x30] sm:$0xff] }
   0xc   :  { %86 = vperm.xlu0 %811, %v52_v11   ;;  %v365_v34 = vld [vmem:[%s1053_s4 + $0x38] sm:$0xff]  ;;  %v366_v35 = vld [vmem:[%s1053_s4 + $0x40] sm:$0xff]  ;;  %v367_v36 = vld [vmem:[%s1053_s4 + $0x48] sm:$0xff] }
   0xd   :  { %91 = vperm.xlu1 %812, %v53_v13   ;;  %v368_v37 = vld [vmem:[%s1053_s4 + $0x50] sm:$0xff]  ;;  %v369_v38 = vld [vmem:[%s1053_s4 + $0x58] sm:$0xff]  ;;  %v370_v39 = vld [vmem:[%s1053_s4 + $0x60] sm:$0xff] }
   0xe   :  { %v371_v40 = vld [vmem:[%s1053_s4 + $0x68] sm:$0xff]  ;;  %v372_v41 = vld [vmem:[%s1053_s4 + $0x70] sm:$0xff]  ;;  %v373_v42 = vld [vmem:[%s1053_s4 + $0x78] sm:$0xff] }
   0xf   :  { %v624_v43 = vld [vmem:[%s1054_s6] sm:$0xff] }
  0x10   :  { %96 = vperm.xlu0 %811, %v54_v14   ;;  %v823_v44 = vld [vmem:[%s1055_s3] sm:$0xff]  }
  0x11   :  { %101 = vperm.xlu1 %812, %v55_v15   ;;  %772 = vmatprep.mubr.bf16.mxu1 %v823_v44 }
  0x12   :  { %745 = vmatmul.mubr.msk.bf16.gmra.mrb[4].mxu0 %vm196_vm0, %v818_v10 }
  0x13   :  { %748 = vmatprep.mubr.msk.bf16.mxu0 %vm196_vm0, %v819_v12 }
  0x14   :  { %106 = vperm.xlu0 %811, %v56_v17  }
  0x15   :  { %111 = vperm.xlu1 %812, %v57_v19  }
  0x18   :  { %116 = vperm.xlu0 %811, %v58_v20  }
  0x19   :  { %121 = vperm.xlu1 %812, %v59_v21  }
  0x1a   :  { %749 = vmatmul.mubr.msk.bf16.gmra.mrb[8].mxu0 %vm196_vm0, %v820_v16 }
  0x1b   :  { %752 = vmatprep.mubr.msk.bf16.mxu0 %vm196_vm0, %v821_v18 }
  0x1c   :  { %126 = vperm.xlu0 %811, %v60_v23  }
  0x1d   :  { %131 = vperm.xlu1 %812, %v61_v24  }
  0x20   :  { %136 = vperm.xlu0 %811, %v62_v25  }
  0x21   :  { %141 = vperm.xlu1 %812, %v63_v26  }
  0x22   :  { %753 = vmatmul.mubr.msk.bf16.gmra.mrb[12].mxu0 %vm196_vm0, %v822_v22 }
  0x24   :  { %376 = vperm.xlu0 %811, %v358_v27  }
  0x25   :  { %381 = vperm.xlu1 %812, %v359_v28  }
  0x28   :  { %386 = vperm.xlu0 %811, %v360_v29  }
  0x29   :  { %391 = vperm.xlu1 %812, %v361_v30  }
  0x2c   :  { %396 = vperm.xlu0 %811, %v362_v31  }
  0x2d   :  { %401 = vperm.xlu1 %812, %v363_v32  }
  0x30   :  { %406 = vperm.xlu0 %811, %v364_v33  }
  0x31   :  { %411 = vperm.xlu1 %812, %v365_v34  }
  0x34   :  { %416 = vperm.xlu0 %811, %v366_v35  }
  0x35   :  { %421 = vperm.xlu1 %812, %v367_v36  }
  0x38   :  { %426 = vperm.xlu0 %811, %v368_v37  }
  0x39   :  { %431 = vperm.xlu1 %812, %v369_v38  }
  0x3c   :  { %436 = vperm.xlu0 %811, %v370_v39  }
  0x3d   :  { %441 = vperm.xlu1 %812, %v371_v40  }
  0x40   :  { %446 = vperm.xlu0 %811, %v372_v41  }
  0x41   :  { %451 = vperm.xlu1 %812, %v373_v42  }
  0x44   :  { %627 = vperm.xlu0 %811, %v624_v43  }
  0x83   :  { %v67_v45 = vpop.permute.xlu0 %66 }
  0x84   :  { %v77_v46 = vpop.permute.xlu1 %76 }
  0x87   :  { %v72_v47 = vpop.permute.xlu0 %71 }
  0x88   :  { %v82_v48 = vpop.permute.xlu1 %81 }
  0x8b   :  { %v87_v49 = vpop.permute.xlu0 %86 }
  0x8c   :  { %v92_v50 = vpop.permute.xlu1 %91 }
  0x8f   :  { %v97_v52 = vpop.permute.xlu0 %96 }
  0x90   :  { %v102_v54 = vpop.permute.xlu1 %101 }
  0x93   :  { %v107_v63 = vpop.permute.xlu0 %106 }
  0x94   :  { %v112_v0 = vpop.permute.xlu1 %111 }
  0x97   :  { %v117_v13 = vpop.permute.xlu0 %116 }
  0x98   :  { %v122_v15 = vpop.permute.xlu1 %121 }
  0x9b   :  { %v127_v23 = vpop.permute.xlu0 %126 }
  0x9c   :  { %v132_v27 = vpop.permute.xlu1 %131 }
  0x9f   :  { %v137_v36 = vpop.permute.xlu0 %136 }
  0xa0   :  { %v142_v38 = vpop.permute.xlu1 %141 }
  0xdd   :  { %v742_v51 = vpop.f32.mrb[0].mxu0 }
  0xde   :  { %v255_v53 = vpop.f32.mrb[1].mxu0  ;;  %v264_v56 = vadd.f32 %v742_v51, %v77_v46 }
  0xdf   :  { %v743_v55 = vpop.f32.mrb[2].mxu0  ;;  %v256_v59 = vadd.f32 %v255_v53, %v67_v45  ;;  %v824_v53 = vld [vmem:[%s1055_s3 + $0x8] sm:$0xff]  }
  0xe0   :  { %v267_v57 = vadd.f32 %v743_v55, %v82_v48  ;;  %v258_v58 = vpop.f32.mrb[3].mxu0  ;;  %v826_v55 = vld [vmem:[%s1055_s3 + $0x18] sm:$0xff]  }
  0xe1   :  { %v259_v60 = vadd.f32 %v258_v58, %v72_v47  ;;  %v829_v58 = vld [vmem:[%s1055_s3 + $0x30] sm:$0xff]  }
  0xe2   :  { %v319_v61 = vpack.c.bf16 %v267_v57, %v264_v56  ;;  %v827_v56 = vld [vmem:[%s1055_s3 + $0x20] sm:$0xff]   ;;  %v828_v57 = vld [vmem:[%s1055_s3 + $0x28] sm:$0xff]  }
  0xe3   :  { %v318_v62 = vpack.c.bf16 %v259_v60, %v256_v59  ;;  %v830_v59 = vld [vmem:[%s1055_s3 + $0x38] sm:$0xff]   ;;  %v832_v60 = vmov 0.0  }
  0xe4   :  { %v327_v1 = vmul.bf16 1009007652, %v319_v61  ;;  %788 = vmatprep.subr.bf16.mxu0 %v832_v60  ;;  %804 = vmatprep.mubr.msk.bf16.mxu0 %vm833_vm1, %v832_v60 }
  0xe5   :  { %v746_v2 = vpop.f32.mrb[4].mxu0  ;;  %v326_v3 = vmul.bf16 1009007652, %v318_v62 }
  0xe6   :  { %v271_v4 = vpop.f32.mrb[5].mxu0  ;;  %v280_v7 = vadd.f32 %v746_v2, %v97_v52  ;;  %v335_v12 = vmax.bf16 %v327_v1, %v319_v61  ;;  %v377_v61 = vpop.permute.xlu0 %376 }
  0xe7   :  { %v747_v5 = vpop.f32.mrb[6].mxu0  ;;  %v334_v6 = vmax.bf16 %v326_v3, %v318_v62  ;;  %v272_v10 = vadd.f32 %v271_v4, %v87_v49  ;;  %v382_v62 = vpop.permute.xlu1 %381 }
  0xe8   :  { %v283_v8 = vadd.f32 %v747_v5, %v102_v54  ;;  %v274_v9 = vpop.f32.mrb[7].mxu0  ;;  %v825_v54 = vld [vmem:[%s1055_s3 + $0x10] sm:$0xff]  }
  0xe9   :  { %v275_v11 = vadd.f32 %v274_v9, %v92_v50  ;;  %756 = vmatprep.subr.bf16.mxu1 %v334_v6 }
  0xea   :  { %v321_v14 = vpack.c.bf16 %v283_v8, %v280_v7  ;;  %757 = vmatpush3.bf16.msra.mxu1 %v334_v6 }
  0xeb   :  { %v320_v16 = vpack.c.bf16 %v275_v11, %v272_v10  ;;  %758 = vmatprep.subr.bf16.mxu1 %v335_v12 }
  0xec   :  { %v329_v17 = vmul.bf16 1009007652, %v321_v14 }
  0xed   :  { %v328_v18 = vmul.bf16 1009007652, %v320_v16  ;;  %v750_v19 = vpop.f32.mrb[8].mxu0 }
  0xee   :  { %v287_v20 = vpop.f32.mrb[9].mxu0  ;;  %759 = vmatpush3.bf16.msra.mxu1 %v335_v12  ;;  %v296_v24 = vadd.f32 %v750_v19, %v117_v13  ;;  %v337_v30 = vmax.bf16 %v329_v17, %v321_v14 }
  0xef   :  { %v751_v21 = vpop.f32.mrb[10].mxu0  ;;  %v336_v22 = vmax.bf16 %v328_v18, %v320_v16  ;;  %v288_v28 = vadd.f32 %v287_v20, %v107_v63  ;;  %v387_v63 = vpop.permute.xlu0 %386 }
  0xf0   :  { %v299_v25 = vadd.f32 %v751_v21, %v122_v15  ;;  %v290_v26 = vpop.f32.mrb[11].mxu0 }
  0xf1   :  { %v291_v29 = vadd.f32 %v290_v26, %v112_v0  ;;  %760 = vmatprep.subr.bf16.mxu1 %v336_v22  ;;  %v392_v0 = vpop.permute.xlu1 %391 }
  0xf2   :  { %v323_v31 = vpack.c.bf16 %v299_v25, %v296_v24  ;;  %761 = vmatpush3.bf16.msra.mxu1 %v336_v22 }
  0xf3   :  { %v322_v32 = vpack.c.bf16 %v291_v29, %v288_v28  ;;  %762 = vmatprep.subr.bf16.mxu1 %v337_v30  ;;  %v397_v1 = vpop.permute.xlu0 %396 }
  0xf4   :  { %v331_v33 = vmul.bf16 1009007652, %v323_v31 }
  0xf5   :  { %v330_v34 = vmul.bf16 1009007652, %v322_v32  ;;  %v754_v35 = vpop.f32.mrb[12].mxu0  ;;  %v402_v2 = vpop.permute.xlu1 %401 }
  0xf6   :  { %v303_v37 = vpop.f32.mrb[13].mxu0  ;;  %763 = vmatpush3.bf16.msra.mxu1 %v337_v30  ;;  %v312_v41 = vadd.f32 %v754_v35, %v137_v36  ;;  %v339_v46 = vmax.bf16 %v331_v33, %v323_v31 }
  0xf7   :  { %v755_v39 = vpop.f32.mrb[14].mxu0  ;;  %v338_v40 = vmax.bf16 %v330_v34, %v322_v32  ;;  %v304_v44 = vadd.f32 %v303_v37, %v127_v23  ;;  %v407_v4 = vpop.permute.xlu0 %406 }
  0xf8   :  { %v315_v42 = vadd.f32 %v755_v39, %v142_v38  ;;  %v306_v43 = vpop.f32.mrb[15].mxu0 }
  0xf9   :  { %v307_v45 = vadd.f32 %v306_v43, %v132_v27  ;;  %764 = vmatprep.subr.bf16.mxu1 %v338_v40  ;;  %v412_v6 = vpop.permute.xlu1 %411 }
  0xfa   :  { %v325_v47 = vpack.c.bf16 %v315_v42, %v312_v41  ;;  %765 = vmatpush3.bf16.msra.mxu1 %v338_v40 }
  0xfb   :  { %v324_v48 = vpack.c.bf16 %v307_v45, %v304_v44  ;;  %766 = vmatprep.subr.bf16.mxu1 %v339_v46  ;;  %v417_v15 = vpop.permute.xlu0 %416 }
  0xfc   :  { %v333_v49 = vmul.bf16 1009007652, %v325_v47 }
  0xfd   :  { %v332_v50 = vmul.bf16 1009007652, %v324_v48  ;;  %v422_v16 = vpop.permute.xlu1 %421 }
  0xfe   :  { %767 = vmatpush3.bf16.msra.mxu1 %v339_v46  ;;  %v341_v52 = vmax.bf16 %v333_v49, %v325_v47 }
  0xff   :  { %v340_v51 = vmax.bf16 %v332_v50, %v324_v48  ;;  %v427_v28 = vpop.permute.xlu0 %426 }
 0x101   :  { %768 = vmatprep.subr.bf16.mxu1 %v340_v51  ;;  %v432_v30 = vpop.permute.xlu1 %431 }
 0x102   :  { %769 = vmatpush3.bf16.msra.mxu1 %v340_v51 }
 0x103   :  { %770 = vmatprep.subr.bf16.mxu1 %v341_v52  ;;  %v437_v39 = vpop.permute.xlu0 %436 }
 0x105   :  { %v442_v43 = vpop.permute.xlu1 %441 }
 0x106   :  { %771 = vmatpush3.bf16.msra.mxu1 %v341_v52 }
 0x107   :  { %v447_v51 = vpop.permute.xlu0 %446 }
 0x109   :  { %773 = vmatmul.mubr.bf16.vlgmr.msra.gmra.mrb[0].mxu1 %v824_v53  ;;  %v452_v53 = vpop.permute.xlu1 %451 }
 0x10a   :  { %776 = vmatprep.mubr.bf16.mxu1 %v825_v54 }
 0x111   :  { %777 = vmatmul.mubr.bf16.gmra.mrb[4].mxu1 %v826_v55 }
 0x112   :  { %780 = vmatprep.mubr.bf16.mxu1 %v827_v56 }
 0x119   :  { %781 = vmatmul.mubr.bf16.gmra.mrb[8].mxu1 %v828_v57 }
 0x11a   :  { %784 = vmatprep.mubr.bf16.mxu1 %v829_v58 }
 0x121   :  { %785 = vmatmul.mubr.bf16.gmra.mrb[12].mxu1 %v830_v59 }
 0x1dc   :  { %v774_v3 = vpop.f32.mrb[0].mxu1 }
 0x1dd   :  { %v536_v5 = vpop.f32.mrb[1].mxu1  ;;  %v545_v8 = vadd.f32 %v774_v3, %v387_v63 }
 0x1de   :  { %v775_v7 = vpop.f32.mrb[2].mxu1  ;;  %v537_v11 = vadd.f32 %v536_v5, %v377_v61 }
 0x1df   :  { %v548_v9 = vadd.f32 %v775_v7, %v392_v0  ;;  %v539_v10 = vpop.f32.mrb[3].mxu1  ;;  %v628_v7 = vpop.permute.xlu0 %627 }
 0x1e0   :  { %v540_v12 = vadd.f32 %v539_v10, %v382_v62 }
 0x1e1   :  { %v600_v13 = vpack.c.bf16 %v548_v9, %v545_v8 }
 0x1e2   :  { %v599_v14 = vpack.c.bf16 %v540_v12, %v537_v11 }
 0x1e3   :  { %v608_v20 = vmul.bf16 1009007652, %v600_v13 }
 0x1e4   :  { %v607_v17 = vmul.bf16 1009007652, %v599_v14  ;;  %v778_v18 = vpop.f32.mrb[4].mxu1 }
 0x1e5   :  { %v552_v19 = vpop.f32.mrb[5].mxu1  ;;  %v561_v23 = vadd.f32 %v778_v18, %v407_v4  ;;  %v616_v31 = vmax.bf16 %v608_v20, %v600_v13 }
 0x1e6   :  { %v615_v21 = vmax.bf16 %v607_v17, %v599_v14  ;;  %v779_v22 = vpop.f32.mrb[6].mxu1  ;;  %v553_v26 = vadd.f32 %v552_v19, %v397_v1 }
 0x1e7   :  { %v564_v24 = vadd.f32 %v779_v22, %v412_v6  ;;  %v555_v25 = vpop.f32.mrb[7].mxu1  ;;  %v623_v6 = vld [vmem:[%s1056_s5] sm:$0xf] }
 0x1e8   :  { %v556_v27 = vadd.f32 %v555_v25, %v402_v2  ;;  %789 = vmatpush3.bf16.msra.mxu0 %v615_v21 }
 0x1e9   :  { %v602_v29 = vpack.c.bf16 %v564_v24, %v561_v23  ;;  %790 = vmatprep.subr.bf16.mxu0 %v832_v60 }
 0x1ea   :  { %v601_v32 = vpack.c.bf16 %v556_v27, %v553_v26 }
 0x1eb   :  { %v610_v36 = vmul.bf16 1009007652, %v602_v29 }
 0x1ec   :  { %v609_v33 = vmul.bf16 1009007652, %v601_v32  ;;  %v782_v34 = vpop.f32.mrb[8].mxu1  ;;  %791 = vmatpush3.bf16.msra.mxu0 %v616_v31 }
 0x1ed   :  { %v568_v35 = vpop.f32.mrb[9].mxu1  ;;  %792 = vmatprep.subr.bf16.mxu0 %v832_v60  ;;  %v577_v40 = vadd.f32 %v782_v34, %v427_v28  ;;  %v618_v47 = vmax.bf16 %v610_v36, %v602_v29 }
 0x1ee   :  { %v617_v37 = vmax.bf16 %v609_v33, %v601_v32  ;;  %v783_v38 = vpop.f32.mrb[10].mxu1  ;;  %v569_v44 = vadd.f32 %v568_v35, %v417_v15 }
 0x1ef   :  { %v580_v41 = vadd.f32 %v783_v38, %v432_v30  ;;  %v571_v42 = vpop.f32.mrb[11].mxu1 }
 0x1f0   :  { %v572_v45 = vadd.f32 %v571_v42, %v422_v16  ;;  %793 = vmatpush3.bf16.msra.mxu0 %v617_v37 }
 0x1f1   :  { %v604_v46 = vpack.c.bf16 %v580_v41, %v577_v40  ;;  %794 = vmatprep.subr.bf16.mxu0 %v832_v60 }
 0x1f2   :  { %v603_v48 = vpack.c.bf16 %v572_v45, %v569_v44 }
 0x1f3   :  { %v612_v54 = vmul.bf16 1009007652, %v604_v46 }
 0x1f4   :  { %v611_v49 = vmul.bf16 1009007652, %v603_v48  ;;  %v786_v50 = vpop.f32.mrb[12].mxu1  ;;  %795 = vmatpush3.bf16.msra.mxu0 %v618_v47 }
 0x1f5   :  { %v584_v52 = vpop.f32.mrb[13].mxu1  ;;  %796 = vmatprep.subr.bf16.mxu0 %v832_v60  ;;  %v593_v57 = vadd.f32 %v786_v50, %v447_v51  ;;  %v620_v0 = vmax.bf16 %v612_v54, %v604_v46 }
 0x1f6   :  { %v619_v55 = vmax.bf16 %v611_v49, %v603_v48  ;;  %v787_v56 = vpop.f32.mrb[14].mxu1  ;;  %v585_v61 = vadd.f32 %v584_v52, %v437_v39 }
 0x1f7   :  { %v596_v58 = vadd.f32 %v787_v56, %v452_v53  ;;  %v587_v59 = vpop.f32.mrb[15].mxu1 }
 0x1f8   :  { %v588_v62 = vadd.f32 %v587_v59, %v442_v43  ;;  %797 = vmatpush3.bf16.msra.mxu0 %v619_v55 }
 0x1f9   :  { %v606_v63 = vpack.c.bf16 %v596_v58, %v593_v57  ;;  %798 = vmatprep.subr.bf16.mxu0 %v832_v60 }
 0x1fa   :  { %v605_v1 = vpack.c.bf16 %v588_v62, %v585_v61 }
 0x1fb   :  { %v614_v3 = vmul.bf16 1009007652, %v606_v63 }
 0x1fc   :  { %v613_v2 = vmul.bf16 1009007652, %v605_v1  ;;  %799 = vmatpush3.bf16.msra.mxu0 %v620_v0 }
 0x1fd   :  { %800 = vmatprep.subr.bf16.mxu0 %v832_v60  ;;  %v622_v5 = vmax.bf16 %v614_v3, %v606_v63 }
 0x1fe   :  { %v621_v4 = vmax.bf16 %v613_v2, %v605_v1 }
 0x200   :  { %801 = vmatpush3.bf16.msra.mxu0 %v621_v4 }
 0x201   :  { %802 = vmatprep.subr.bf16.mxu0 %v832_v60 }
 0x204   :  { %803 = vmatpush3.bf16.msra.mxu0 %v622_v5 }
 0x207   :  { %805 = vmatmul.mubr.bf16.vlgmr.msra.gmra.mrb[16].mxu0 %v623_v6 }
 0x2da   :  { %v664_v8 = vpop.f32.mrb[16].mxu0 }
 0x2db   :  { %v665_v9 = vadd.f32 %v664_v8, %v628_v7  ;;  %v806_v10 = vpop.f32.mrb[17].mxu0 }
 0x2dc   :  { %v667_v11 = vpop.f32.mrb[18].mxu0 }
 0x2dd   :  { %670 = vst [vmem:[%s1057_s7] sm:$0xff] %v665_v9  ;;  %v807_v12 = vpop.f32.mrb[19].mxu0 }

</bundles_post_ra>
